<compile_context>
chip_gen: v5e
topology: v5e:2x2
jax: 0.10.0
libtpu: 0.0.40
codegen_flags: <defaults>
</compile_context>

<pallas_src>
import functools

import jax
import jax.numpy as jnp
from jax.experimental import pallas as pl
from jax.experimental.pallas import tpu as pltpu


def _round_up(x, m):
    return ((x + m - 1) // m) * m


def _vmem_limit_bytes():
    """Scoped-VMEM limit: ~half of physical (64 MiB on v5e/v6e, 32 MiB on v7x)."""
    cap = 64 * 1024 * 1024  # conservative fallback = v7x per-core physical
    try:
        info = pltpu.get_tpu_info()
        cap = int(getattr(info, "vmem_capacity_bytes", cap))
    except Exception:
        pass
    return min(cap // 2, 64 * 1024 * 1024)


def _auto_tile_rows(exponent_count, lane_width, vmem_limit_bytes):
    """Pick tile rows so double-buffered I/O + f32 intermediates fit comfortably."""
    lane_pad = _round_up(max(lane_width, 1), 128)
    row_bytes = lane_pad * 4  # one f32 row in VMEM (lanes padded to 128)
    # 4 double-buffered I/O rows + (2 + E) power-chain rows + E stacked-feature
    # rows + 1 dot-result row (rough, compiler may reuse some).
    per_row = (4 + 2 + exponent_count + exponent_count + 1) * row_bytes
    budget = (vmem_limit_bytes * 3) // 4
    tr = budget // per_row
    return int(max(8, min(16384, (tr // 8) * 8)))


def _exponent_lambda_kernel(y_ref, w_ref, o_ref, *, exponent_count):
    # y_ref: (TR, L)      lane-dense batch-major tile (L = fold * D)
    # w_ref: (E*L, L)     stacked block-diagonal weights, resident across grid
    # o_ref: (TR, L)
    y32 = y_ref[...].astype(jnp.float32)   # power chain in f32 on the VPU

    powers = [y32]
    p = y32
    for _ in range(1, exponent_count):
        p = p * y32
        powers.append(p)

    if exponent_count > 1:
        feats = jnp.concatenate(powers, axis=-1)       # (TR, E*L), lane-aligned
    else:
        feats = powers[0]
    feats = feats.astype(w_ref.dtype)                  # single cast (bf16 path)

    out = jnp.dot(feats, w_ref[...], preferred_element_type=jnp.float32)
    o_ref[...] = out.astype(o_ref.dtype)


def exponent_lambda_forward(t, y, coefficient_matrix, exponent_count, *, tile_rows=None):
    """Pallas equivalent of ExponentLambda.forward(t, y). `t` is unused."""
    del t
    B, D = y.shape
    ED, D2 = coefficient_matrix.shape
    assert D2 == D and ED == exponent_count * D

    # Fold `fold` consecutive batch rows into one lane-dense row (zero-copy,
    # row-major reshape). For D <= 128 this gives (near-)full 128-lane rows.
    fold = max(1, 128 // D)
    L = fold * D

    # Weights: stacked block-diagonal kron(I_fold, C_e), built once, resident.
    mm_dtype = jnp.bfloat16 if y.dtype == jnp.bfloat16 else jnp.float32
    c3 = coefficient_matrix.reshape(exponent_count, D, D).astype(mm_dtype)
    if fold > 1:
        eye = jnp.eye(fold, dtype=mm_dtype)
        # W[e*L + g*D + a, h*D + b] = (g == h) * C_e[a, b]
        w = jnp.einsum("gh,eab->egahb", eye, c3).reshape(exponent_count * L, L)
    else:
        w = coefficient_matrix.astype(mm_dtype)

    rows = pl.cdiv(B, fold)  # rows in the folded layout
    vmem_limit = _vmem_limit_bytes()
    if tile_rows is None:
        tile_rows = _auto_tile_rows(exponent_count, L, vmem_limit)

    if rows <= tile_rows:
        # Single block equal to the full (folded) array dims -> valid layout
        # regardless of (8, 128) divisibility.
        tr, rows_pad, grid = rows, rows, (1,)
    else:
        tr = max(8, (tile_rows // 8) * 8)
        # Keep >= ~8 grid steps when the batch is large (2-TC balance on v7x)
        # without shrinking tiles below ~512 rows.
        tr = min(tr, max(512, _round_up(pl.cdiv(rows, 8), 8)))
        rows_pad = _round_up(rows, tr)
        grid = (rows_pad // tr,)

    b_pad = rows_pad * fold
    if b_pad != B:
        y = jnp.pad(y, ((0, b_pad - B), (0, 0)))  # zero rows -> zero outputs, sliced off
    y_r = y.reshape(rows_pad, L)                  # zero-copy reshape, no transpose

    cost = pl.CostEstimate(
        flops=2 * rows_pad * (exponent_count * L) * L
        + rows_pad * L * max(exponent_count - 1, 0),
        transcendentals=0,
        bytes_accessed=y.dtype.itemsize * rows_pad * L      # input tile traffic
        + y.dtype.itemsize * rows_pad * L                   # output tile traffic
        + w.dtype.itemsize * w.size,                        # resident weights
    )

    kernel = functools.partial(_exponent_lambda_kernel, exponent_count=exponent_count)
    out_r = pl.pallas_call(
        kernel,
        out_shape=jax.ShapeDtypeStruct((rows_pad, L), y.dtype),
        grid=grid,
        in_specs=[
            pl.BlockSpec((tr, L), lambda i: (i, 0)),                      # y tile
            pl.BlockSpec((exponent_count * L, L), lambda i: (0, 0)),      # resident W
        ],
        out_specs=pl.BlockSpec((tr, L), lambda i: (i, 0)),
        compiler_params=pltpu.CompilerParams(
            dimension_semantics=("parallel",),   # 2-TC sharding on v7x; harmless elsewhere
            vmem_limit_bytes=vmem_limit,
        ),
        cost_estimate=cost,
    )(y_r, w)

    out = out_r.reshape(b_pad, D)                 # zero-copy reshape back
    return out if b_pad == B else out[:B]


def _reference(t, y, coefficient_matrix, exponent_count):
    del t
    feats = jnp.concatenate([y**e for e in range(1, exponent_count + 1)], axis=-1)
    return feats @ coefficient_matrix


if __name__ == "__main__":
    # Small, deterministic problem consistent with the module.
    dimension = 8
    exponent_count = 4
    batch = 8

    key = jax.random.PRNGKey(0)
    k_y, k_c, k_y2, k_c2 = jax.random.split(key, 4)

    # Keep y near 1 so powers stay well-conditioned.
    y = (0.5 + 0.5 * jax.random.uniform(k_y, (batch, dimension))).astype(jnp.float32)
    coefficient_matrix = (
        0.1 * jax.random.normal(k_c, (exponent_count * dimension, dimension))
    ).astype(jnp.float32)
    t = jnp.float32(0.0)  # unused, matches the ODE-style signature

    out = exponent_lambda_forward(t, y, coefficient_matrix, exponent_count)
    out = jax.block_until_ready(out)
    ref = _reference(t, y, coefficient_matrix, exponent_count)
    assert out.shape == (batch, dimension)
    assert jnp.allclose(out, ref, atol=1e-5, rtol=1e-5), "mismatch vs reference (small)"

    # Second case: exercises the tiled, padded, multi-step grid path.
    batch2, exponent_count2 = 300, 3
    y2 = (0.5 + 0.5 * jax.random.uniform(k_y2, (batch2, dimension))).astype(jnp.float32)
    cmat2 = (
        0.1 * jax.random.normal(k_c2, (exponent_count2 * dimension, dimension))
    ).astype(jnp.float32)
    out2 = exponent_lambda_forward(t, y2, cmat2, exponent_count2, tile_rows=8)
    out2 = jax.block_until_ready(out2)
    ref2 = _reference(t, y2, cmat2, exponent_count2)
    assert out2.shape == (batch2, dimension)
    assert jnp.allclose(out2, ref2, atol=1e-5, rtol=1e-5), "mismatch vs reference (tiled)"

    print("KERNEL_OK")
</pallas_src>

<mosaic_0001>
module attributes {stable_mosaic.version = 11 : i64} {
  func.func @_exponent_lambda_kernel(%arg0: i32, %arg1: memref<1x128xf32, #tpu.memory_space<vmem>>, %arg2: memref<512x128xf32, #tpu.memory_space<vmem>>, %arg3: memref<1x128xf32, #tpu.memory_space<vmem>>) attributes {dimension_semantics = [#tpu.dimension_semantics<parallel>], iteration_bounds = array<i64: 1>, scalar_prefetch = 0 : i64, scratch_operands = 0 : i64, tpu.core_type = #tpu.core_type<tc>, window_params = [{transform_indices = @transform_0, window_bounds = array<i64: 1, 128>}, {pipeline_mode = #tpu.pipeline_mode<synchronous>, transform_indices = @transform_1, window_bounds = array<i64: 512, 128>}, {transform_indices = @transform_2, window_bounds = array<i64: 1, 128>}]} {
    %c0 = arith.constant 0 : index
    %c0_0 = arith.constant 0 : index
    %0 = vector.load %arg1[%c0, %c0_0] : memref<1x128xf32, #tpu.memory_space<vmem>>, vector<1x128xf32>
    %1 = arith.mulf %0, %0 : vector<1x128xf32>
    %2 = arith.mulf %1, %0 : vector<1x128xf32>
    %3 = arith.mulf %2, %0 : vector<1x128xf32>
    %4 = tpu.concatenate %0, %1, %2, %3 in 1 : vector<1x128xf32>, vector<1x128xf32>, vector<1x128xf32>, vector<1x128xf32> -> vector<1x512xf32>
    %c0_1 = arith.constant 0 : index
    %c0_2 = arith.constant 0 : index
    %5 = vector.load %arg2[%c0_1, %c0_2] : memref<512x128xf32, #tpu.memory_space<vmem>>, vector<512x128xf32>
    %cst = arith.constant dense<0.000000e+00> : vector<1x128xf32>
    %6 = tpu.matmul %4, %5, %cst {dimension_numbers = #tpu.dot_dimension_numbers<[1], [0], [0], [1], [0, 0, 1, 1], [], []>} : vector<1x512xf32>, vector<512x128xf32>, vector<1x128xf32> -> vector<1x128xf32>
    %c0_3 = arith.constant 0 : index
    %c0_4 = arith.constant 0 : index
    %7 = vector.load %arg3[%c0_3, %c0_4] : memref<1x128xf32, #tpu.memory_space<vmem>>, vector<1x128xf32>
    tpu.vector_store %arg3[%c0_3, %c0_4], %6 {strides = array<i32>} : memref<1x128xf32, #tpu.memory_space<vmem>>, vector<1x128xf32>,
    return
  }
  func.func @transform_0(%arg0: i32) -> (i32, i32) {
    %c0_i32 = arith.constant 0 : i32
    %c0_i32_0 = arith.constant 0 : i32
    return %arg0, %c0_i32 : i32, i32
  }
  func.func @transform_1(%arg0: i32) -> (i32, i32) {
    %c0_i32 = arith.constant 0 : i32
    %c0_i32_0 = arith.constant 0 : i32
    %c0_i32_1 = arith.constant 0 : i32
    return %c0_i32, %c0_i32_0 : i32, i32
  }
  func.func @transform_2(%arg0: i32) -> (i32, i32) {
    %c0_i32 = arith.constant 0 : i32
    %c0_i32_0 = arith.constant 0 : i32
    return %arg0, %c0_i32 : i32, i32
  }
}

</mosaic_0001>

<bundles_post_ra>
// kernel: tpu_custom_call.1
= control target key start
LH: loop header
LB: loop body
LE: loop exit
PB: predicated region body
PF: predicated region fallthrough
CT: control target
= control target key end

     0   :  { %7 = vsyncpa [#allocation3], 0  ;;  %s321_s0 = inlined_call_operand.hbm [shape: f32[1,128], index: 0, kind: input, shape index: {}]   ;;  %s322_s1 = inlined_call_operand.hbm [shape: f32[512,128], index: 1, kind: input, shape index: {}]   ;;  %s323_s2 = inlined_call_operand.hbm [shape: f32[1,128], index: 2, kind: output, shape index: {}]  }
   0x1   :  { %8 = vsyncpa [#allocation6], 0 }
   0x2   :  { %9 = vsyncpa [#allocation4], 0  ;;  %s15_s11 = sshll.u32 %s321_s0, 4  ;;  %s292_s12 = smov [#allocation2]   ;;  %s16_s11 = int_to_ptr.hbm [resolvable:$true] %s15_s11 }
   0x3   :  { %s17_s13 = sshll.u32 %s292_s12, 4  ;;  %s25_s16 = sshll.u32 %s322_s1, 4  ;;  %s18_s13 = int_to_ptr.vmem [resolvable:$true] %s17_s13  ;;  %s26_s16 = int_to_ptr.hbm [resolvable:$true] %s25_s16 }
   0x4   :  { %20 = dma.hbm_to_vmem [thread:$0]  %s16_s11, 16, %s18_s13, [#allocation3]  }
   0x5   :  { %s293_s17 = smov [#allocation5]   ;;  %s294_s19 = smov 128  }
   0x6   :  { %s27_s18 = sshll.u32 %s293_s17, 4  ;;  %s295_s20 = smov 8   ;;  %s28_s18 = int_to_ptr.vmem [resolvable:$true] %s27_s18 }
   0x7   :  { %33 = dma.hbm_to_vmem [thread:$0]  %s26_s16, 8192, %s28_s18, [#allocation6], %s294_s19, %s294_s19, %s295_s20  }
   0x8   :  { %286 = dma.done.wait [#allocation3], 16  }
   0x9   :  { %287 = vsyncadd [#allocation3], 4294967280 }
   0xa   :  { %288 = dma.done.wait [#allocation6], 8192  }
   0xb   :  { %289 = vsyncadd [#allocation6], 4294959104  ;;  %v93_v0 = vld [vmem:[#allocation5 + $0x178] sm:$0xff]  ;;  %v92_v1 = vld [vmem:[#allocation5 + $0x170] sm:$0xff]  ;;  %s296_s0 = smov [#allocation7]   ;;  %s198_s23 = sshll.u32 %s323_s2, 4  ;;  %s199_s23 = int_to_ptr.hbm [resolvable:$true] %s198_s23 }
   0xc   :  { %v109_v2 = vld [vmem:[#allocation5 + $0x1f8] sm:$0xff]  ;;  %150 = vmatpush.msra.mxu2 %v93_v0  ;;  %v91_v5 = vld [vmem:[#allocation5 + $0x168] sm:$0xff]  ;;  %v108_v6 = vld [vmem:[#allocation5 + $0x1f0] sm:$0xff]  ;;  %s196_s1 = sshll.u32 %s296_s0, 4  ;;  %s197_s1 = int_to_ptr.vmem [resolvable:$true] %s196_s1 }
   0xd   :  { %170 = vmatpush.msra.mxu3 %v109_v2  ;;  %v61_v3 = vld [vmem:[#allocation5 + $0x78] sm:$0xff]  ;;  %v60_v7 = vld [vmem:[#allocation5 + $0x70] sm:$0xff]  ;;  %v107_v9 = vld [vmem:[#allocation5 + $0x1e8] sm:$0xff] }
   0xe   :  { %v77_v4 = vld [vmem:[#allocation5 + $0xf8] sm:$0xff]  ;;  %110 = vmatpush.msra.mxu0 %v61_v3  ;;  %v76_v8 = vld [vmem:[#allocation5 + $0xf0] sm:$0xff]  ;;  %151 = vmatpush.msra.mxu2 %v92_v1  ;;  %v59_v10 = vld [vmem:[#allocation5 + $0x68] sm:$0xff] }
   0xf   :  { %130 = vmatpush.msra.mxu1 %v77_v4  ;;  %171 = vmatpush.msra.mxu3 %v108_v6  ;;  %v90_v11 = vld [vmem:[#allocation5 + $0x160] sm:$0xff]  ;;  %v75_v12 = vld [vmem:[#allocation5 + $0xe8] sm:$0xff]  ;;  %v89_v16 = vld [vmem:[#allocation5 + $0x158] sm:$0xff] }
  0x10   :  { %111 = vmatpush.msra.mxu0 %v60_v7  ;;  %v106_v13 = vld [vmem:[#allocation5 + $0x1e0] sm:$0xff]  ;;  %152 = vmatpush.msra.mxu2 %v91_v5  ;;  %v105_v17 = vld [vmem:[#allocation5 + $0x1d8] sm:$0xff]  ;;  %v88_v20 = vld [vmem:[#allocation5 + $0x150] sm:$0xff] }
  0x11   :  { %131 = vmatpush.msra.mxu1 %v76_v8  ;;  %172 = vmatpush.msra.mxu3 %v107_v9  ;;  %v58_v14 = vld [vmem:[#allocation5 + $0x60] sm:$0xff]  ;;  %v57_v18 = vld [vmem:[#allocation5 + $0x58] sm:$0xff]  ;;  %v104_v21 = vld [vmem:[#allocation5 + $0x1d0] sm:$0xff] }
  0x12   :  { %v74_v15 = vld [vmem:[#allocation5 + $0xe0] sm:$0xff]  ;;  %112 = vmatpush.msra.mxu0 %v59_v10  ;;  %153 = vmatpush.msra.mxu2 %v90_v11  ;;  %v73_v19 = vld [vmem:[#allocation5 + $0xd8] sm:$0xff]  ;;  %v56_v22 = vld [vmem:[#allocation5 + $0x50] sm:$0xff] }
  0x13   :  { %132 = vmatpush.msra.mxu1 %v75_v12  ;;  %173 = vmatpush.msra.mxu3 %v106_v13  ;;  %v72_v23 = vld [vmem:[#allocation5 + $0xd0] sm:$0xff]  ;;  %v87_v24 = vld [vmem:[#allocation5 + $0x148] sm:$0xff]  ;;  %v86_v28 = vld [vmem:[#allocation5 + $0x140] sm:$0xff] }
  0x14   :  { %113 = vmatpush.msra.mxu0 %v58_v14  ;;  %154 = vmatpush.msra.mxu2 %v89_v16  ;;  %v103_v25 = vld [vmem:[#allocation5 + $0x1c8] sm:$0xff]  ;;  %v102_v29 = vld [vmem:[#allocation5 + $0x1c0] sm:$0xff]  ;;  %v85_v32 = vld [vmem:[#allocation5 + $0x138] sm:$0xff] }
  0x15   :  { %133 = vmatpush.msra.mxu1 %v74_v15  ;;  %174 = vmatpush.msra.mxu3 %v105_v17  ;;  %v55_v26 = vld [vmem:[#allocation5 + $0x48] sm:$0xff]  ;;  %v54_v30 = vld [vmem:[#allocation5 + $0x40] sm:$0xff]  ;;  %v101_v33 = vld [vmem:[#allocation5 + $0x1b8] sm:$0xff] }
  0x16   :  { %114 = vmatpush.msra.mxu0 %v57_v18  ;;  %155 = vmatpush.msra.mxu2 %v88_v20  ;;  %v71_v27 = vld [vmem:[#allocation5 + $0xc8] sm:$0xff]  ;;  %v70_v31 = vld [vmem:[#allocation5 + $0xc0] sm:$0xff]  ;;  %v53_v34 = vld [vmem:[#allocation5 + $0x38] sm:$0xff] }
  0x17   :  { %134 = vmatpush.msra.mxu1 %v73_v19  ;;  %175 = vmatpush.msra.mxu3 %v104_v21  ;;  %v69_v35 = vld [vmem:[#allocation5 + $0xb8] sm:$0xff]  ;;  %v84_v36 = vld [vmem:[#allocation5 + $0x130] sm:$0xff]  ;;  %v83_v40 = vld [vmem:[#allocation5 + $0x128] sm:$0xff] }
  0x18   :  { %115 = vmatpush.msra.mxu0 %v56_v22  ;;  %156 = vmatpush.msra.mxu2 %v87_v24  ;;  %v100_v37 = vld [vmem:[#allocation5 + $0x1b0] sm:$0xff]  ;;  %v99_v41 = vld [vmem:[#allocation5 + $0x1a8] sm:$0xff]  ;;  %v42_v44 = vld [vmem:[#allocation2] sm:$0x1] }
  0x19   :  { %135 = vmatpush.msra.mxu1 %v72_v23  ;;  %176 = vmatpush.msra.mxu3 %v103_v25  ;;  %v52_v38 = vld [vmem:[#allocation5 + $0x30] sm:$0xff]  ;;  %v51_v42 = vld [vmem:[#allocation5 + $0x28] sm:$0xff]  ;;  %v82_v45 = vld [vmem:[#allocation5 + $0x120] sm:$0xff]  ;;  %v43_v47 = vmul.f32 %v42_v44, %v42_v44 }
  0x1a   :  { %116 = vmatpush.msra.mxu0 %v55_v26  ;;  %157 = vmatpush.msra.mxu2 %v86_v28  ;;  %v68_v39 = vld [vmem:[#allocation5 + $0xb0] sm:$0xff]  ;;  %v67_v43 = vld [vmem:[#allocation5 + $0xa8] sm:$0xff]  ;;  %v98_v46 = vld [vmem:[#allocation5 + $0x1a0] sm:$0xff] }
  0x1b   :  { %136 = vmatpush.msra.mxu1 %v71_v27  ;;  %177 = vmatpush.msra.mxu3 %v102_v29  ;;  %v50_v48 = vld [vmem:[#allocation5 + $0x20] sm:$0xff]  ;;  %v81_v50 = vld [vmem:[#allocation5 + $0x118] sm:$0xff]  ;;  %v80_v54 = vld [vmem:[#allocation5 + $0x110] sm:$0xff]  ;;  %v44_v56 = vmul.f32 %v43_v47, %v42_v44 }
  0x1c   :  { %117 = vmatpush.msra.mxu0 %v54_v30  ;;  %158 = vmatpush.msra.mxu2 %v85_v32  ;;  %v66_v49 = vld [vmem:[#allocation5 + $0xa0] sm:$0xff]  ;;  %v97_v51 = vld [vmem:[#allocation5 + $0x198] sm:$0xff]  ;;  %v96_v55 = vld [vmem:[#allocation5 + $0x190] sm:$0xff] }
  0x1d   :  { %137 = vmatpush.msra.mxu1 %v70_v31  ;;  %178 = vmatpush.msra.mxu3 %v101_v33  ;;  %v49_v52 = vld [vmem:[#allocation5 + $0x18] sm:$0xff]  ;;  %v48_v57 = vld [vmem:[#allocation5 + $0x10] sm:$0xff]  ;;  %v79_v59 = vld [vmem:[#allocation5 + $0x108] sm:$0xff]  ;;  %v45_v1 = vmul.f32 %v44_v56, %v42_v44 }
  0x1e   :  { %118 = vmatpush.msra.mxu0 %v53_v34  ;;  %159 = vmatpush.msra.mxu2 %v84_v36  ;;  %v65_v53 = vld [vmem:[#allocation5 + $0x98] sm:$0xff]  ;;  %v64_v58 = vld [vmem:[#allocation5 + $0x90] sm:$0xff]  ;;  %v95_v60 = vld [vmem:[#allocation5 + $0x188] sm:$0xff] }
  0x1f   :  { %138 = vmatpush.msra.mxu1 %v69_v35  ;;  %179 = vmatpush.msra.mxu3 %v100_v37  ;;  %v47_v61 = vld [vmem:[#allocation5 + $0x8] sm:$0xff]  ;;  %v78_v63 = vld [vmem:[#allocation5 + $0x100] sm:$0xff] }
  0x20   :  { %119 = vmatpush.msra.mxu0 %v52_v38  ;;  %160 = vmatpush.msra.mxu2 %v83_v40  ;;  %v63_v62 = vld [vmem:[#allocation5 + $0x88] sm:$0xff]  ;;  %v94_v0 = vld [vmem:[#allocation5 + $0x180] sm:$0xff] }
  0x21   :  { %139 = vmatpush.msra.mxu1 %v68_v39  ;;  %180 = vmatpush.msra.mxu3 %v99_v41  ;;  %v46_v2 = vld [vmem:[#allocation5] sm:$0xff] }
  0x22   :  { %120 = vmatpush.msra.mxu0 %v51_v42  ;;  %161 = vmatpush.msra.mxu2 %v82_v45  ;;  %v62_v3 = vld [vmem:[#allocation5 + $0x80] sm:$0xff] }
  0x23   :  { %140 = vmatpush.msra.mxu1 %v67_v43  ;;  %181 = vmatpush.msra.mxu3 %v98_v46 }
  0x24   :  { %121 = vmatpush.msra.mxu0 %v50_v48  ;;  %162 = vmatpush.msra.mxu2 %v81_v50 }
  0x25   :  { %141 = vmatpush.msra.mxu1 %v66_v49  ;;  %182 = vmatpush.msra.mxu3 %v97_v51 }
  0x26   :  { %122 = vmatpush.msra.mxu0 %v49_v52  ;;  %163 = vmatpush.msra.mxu2 %v80_v54 }
  0x27   :  { %142 = vmatpush.msra.mxu1 %v65_v53  ;;  %183 = vmatpush.msra.mxu3 %v96_v55 }
  0x28   :  { %123 = vmatpush.msra.mxu0 %v48_v57  ;;  %164 = vmatpush.msra.mxu2 %v79_v59 }
  0x29   :  { %143 = vmatpush.msra.mxu1 %v64_v58  ;;  %184 = vmatpush.msra.mxu3 %v95_v60 }
  0x2a   :  { %124 = vmatpush.msra.mxu0 %v47_v61  ;;  %165 = vmatpush.msra.mxu2 %v78_v63 }
  0x2b   :  { %144 = vmatpush.msra.mxu1 %v63_v62  ;;  %185 = vmatpush.msra.mxu3 %v94_v0 }
  0x2c   :  { %166 = vmatmul.f32.vlgmr.msra.gmra.mxu2 %v44_v56  ;;  %186 = vmatmul.f32.vlgmr.msra.gmra.mxu3 %v45_v1 }
  0x2d   :  { %125 = vmatpush.msra.mxu0 %v46_v2  ;;  %145 = vmatpush.msra.mxu1 %v62_v3 }
  0x2e   :  { %126 = vmatmul.f32.vlgmr.msra.gmra.mxu0 %v42_v44  ;;  %146 = vmatmul.f32.vlgmr.msra.gmra.mxu1 %v43_v47 }
  0xab   :  { %v127_v4 = vpop.f32.mrf.mxu0  ;;  %v147_v5 = vpop.f32.mrf.mxu1 }
  0xac   :  { %v148_v6 = vadd.f32 %v147_v5, %v127_v4 }
  0xaf   :  { %v167_v7 = vpop.f32.mrf.mxu2  ;;  %v187_v8 = vpop.f32.mrf.mxu3 }
  0xb0   :  { %v168_v9 = vadd.f32 %v167_v7, %v148_v6 }
  0xb2   :  { %v188_v10 = vadd.f32 %v187_v8, %v168_v9 }
  0xb4   :  { %190 = vst [vmem:[#allocation7] sm:$0x1] %v188_v10 }
  0xb5   :  { %201 = dma.vmem_to_hbm [thread:$0]  %s197_s1, 16, %s199_s23, [#allocation4]  }
  0xb6   :  { %290 = dma.done.wait [#allocation4], 16  }
  0xb7   :  { %291 = vsyncadd [#allocation4], 4294967280 }
  0xb8   :  { %206 = vsyncpa [#allocation3], 1 }
  0xb9   :  { %207 = vsyncpa [#allocation6], 1 }
  0xba   :  { %208 = vsyncpa [#allocation4], 1 }

</bundles_post_ra>
